<compile_context>
chip_gen: v7x
topology: tpu7x:2x2x1
jax: 0.10.0
libtpu: 0.0.40
codegen_flags: <defaults>
</compile_context>

<pallas_src>
import functools

import numpy as np
import jax
import jax.numpy as jnp
from jax import lax
from jax.experimental import pallas as pl
from jax.experimental.pallas import tpu as pltpu

_LN_EPS = 1e-5


def _layernorm(x, gamma, beta):
    """LayerNorm over the last axis. gamma/beta broadcast: (1, D)."""
    mu = jnp.mean(x, axis=-1, keepdims=True)
    xc = x - mu
    var = jnp.mean(xc * xc, axis=-1, keepdims=True)
    return xc * lax.rsqrt(var + _LN_EPS) * gamma + beta


def _gelu_tanh(x):
    # TODO(synk): torch nn.GELU() defaults to the exact erf GELU; tanh approximation used here
    # (same formula is used in the reference below, so the comparison is exact).
    c = 0.7978845608028654  # sqrt(2/pi)
    return 0.5 * x * (1.0 + jnp.tanh(c * (x + 0.044715 * x * x * x)))


# ---------------------------------------------------------------------------
# Fused kernels
# ---------------------------------------------------------------------------

def _attn_block_kernel(x_ref, g_ref, b_ref, wq_ref, wk_ref, wv_ref, wo_ref, bo_ref,
                       o_ref, *, heads, scale):
    """One batch element: out = x + OutProj(MultiHeadAttn(LayerNorm(x)))."""
    x = x_ref[0].astype(jnp.float32)                        # (N, D)
    xn = _layernorm(x, g_ref[...], b_ref[...])              # (N, D)

    acc = jnp.zeros(x.shape, dtype=jnp.float32)
    for h in range(heads):                                  # static unroll; heads is small
        q = jnp.dot(xn, wq_ref[h], preferred_element_type=jnp.float32)   # (N, dh)
        k = jnp.dot(xn, wk_ref[h], preferred_element_type=jnp.float32)   # (N, dh)
        v = jnp.dot(xn, wv_ref[h], preferred_element_type=jnp.float32)   # (N, dh)
        # q @ k^T without an explicit transpose (contract the dh axis of both).
        dots = lax.dot_general(q, k, (((1,), (1,)), ((), ())),
                               preferred_element_type=jnp.float32) * scale  # (N, N)
        m = jnp.max(dots, axis=-1, keepdims=True)
        p = jnp.exp(dots - m)
        attn = p / jnp.sum(p, axis=-1, keepdims=True)
        ov = jnp.dot(attn, v, preferred_element_type=jnp.float32)           # (N, dh)
        # Sum of per-head projections == concat(heads) @ W_out
        acc = acc + jnp.dot(ov, wo_ref[h], preferred_element_type=jnp.float32)

    o_ref[0] = (x + acc + bo_ref[...]).astype(o_ref.dtype)


def _ffn_block_kernel(x_ref, g_ref, b_ref, w1_ref, b1_ref, w2_ref, b2_ref, o_ref):
    """One batch element: out = x + W2 @ GELU(W1 @ LayerNorm(x) + b1) + b2."""
    x = x_ref[0].astype(jnp.float32)                        # (N, D)
    xn = _layernorm(x, g_ref[...], b_ref[...])
    h = jnp.dot(xn, w1_ref[...], preferred_element_type=jnp.float32) + b1_ref[...]
    h = _gelu_tanh(h)
    y = jnp.dot(h, w2_ref[...], preferred_element_type=jnp.float32) + b2_ref[...]
    o_ref[0] = (x + y).astype(o_ref.dtype)


# ---------------------------------------------------------------------------
# pallas_call wrappers
# ---------------------------------------------------------------------------

def _full_spec(arr):
    """BlockSpec covering the whole (small) parameter array; VMEM-resident every step."""
    nd = arr.ndim
    return pl.BlockSpec(arr.shape, lambda b, nd=nd: (0,) * nd)


def _attn_block(x, p, *, heads, scale):
    B, N, D = x.shape
    kernel = functools.partial(_attn_block_kernel, heads=heads, scale=scale)
    return pl.pallas_call(
        kernel,
        out_shape=jax.ShapeDtypeStruct((B, N, D), x.dtype),
        grid=(B,),
        in_specs=[
            pl.BlockSpec((1, N, D), lambda b: (b, 0, 0)),
            _full_spec(p["ln_g"]), _full_spec(p["ln_b"]),
            _full_spec(p["wq"]), _full_spec(p["wk"]), _full_spec(p["wv"]),
            _full_spec(p["wo"]), _full_spec(p["bo"]),
        ],
        out_specs=pl.BlockSpec((1, N, D), lambda b: (b, 0, 0)),
        compiler_params=pltpu.CompilerParams(dimension_semantics=("parallel",)),
    )(x, p["ln_g"], p["ln_b"], p["wq"], p["wk"], p["wv"], p["wo"], p["bo"])


def _ffn_block(x, p):
    B, N, D = x.shape
    return pl.pallas_call(
        _ffn_block_kernel,
        out_shape=jax.ShapeDtypeStruct((B, N, D), x.dtype),
        grid=(B,),
        in_specs=[
            pl.BlockSpec((1, N, D), lambda b: (b, 0, 0)),
            _full_spec(p["ln_g"]), _full_spec(p["ln_b"]),
            _full_spec(p["w1"]), _full_spec(p["b1"]),
            _full_spec(p["w2"]), _full_spec(p["b2"]),
        ],
        out_specs=pl.BlockSpec((1, N, D), lambda b: (b, 0, 0)),
        compiler_params=pltpu.CompilerParams(dimension_semantics=("parallel",)),
    )(x, p["ln_g"], p["ln_b"], p["w1"], p["b1"], p["w2"], p["b2"])


# ---------------------------------------------------------------------------
# Module
# ---------------------------------------------------------------------------

class Transformer:
    """JAX/Pallas port of the PyTorch Transformer (pre-norm, layer norm, eval mode)."""

    def __init__(self, dim, depth, heads, dim_head, mlp_dim, dropout=0.0,
                 norm="layer", norm_cond_dim=-1, *, key, dtype=jnp.float32):
        if norm != "layer":
            # TODO(synk): 'ada' (AdaptiveLayerNorm1D) and 'batch' norms are not implemented.
            raise NotImplementedError("only norm='layer' is supported")
        # TODO(synk): dropout > 0 (training-mode) is not applied; eval semantics (no-op).
        self.dim, self.depth = dim, depth
        self.heads, self.dim_head, self.mlp_dim = heads, dim_head, mlp_dim
        self.scale = dim_head ** (-0.5)
        inner = heads * dim_head
        project_out = not (heads == 1 and dim_head == dim)

        layers = []
        for _ in range(depth):
            key, *ks = jax.random.split(key, 11)
            attn_p = dict(
                ln_g=(1.0 + 0.1 * jax.random.normal(ks[0], (1, dim), dtype)),
                ln_b=(0.1 * jax.random.normal(ks[1], (1, dim), dtype)),
                wq=jax.random.normal(ks[2], (heads, dim, dim_head), dtype) / np.sqrt(dim),
                wk=jax.random.normal(ks[3], (heads, dim, dim_head), dtype) / np.sqrt(dim),
                wv=jax.random.normal(ks[4], (heads, dim, dim_head), dtype) / np.sqrt(dim),
            )
            if project_out:
                attn_p["wo"] = jax.random.normal(ks[5], (heads, dim_head, dim), dtype) / np.sqrt(inner)
                attn_p["bo"] = 0.1 * jax.random.normal(ks[6], (1, dim), dtype)
            else:  # to_out is Identity in the reference -> identity projection, zero bias
                attn_p["wo"] = jnp.eye(dim, dtype=dtype)[None]
                attn_p["bo"] = jnp.zeros((1, dim), dtype)
            ffn_p = dict(
                ln_g=(1.0 + 0.1 * jax.random.normal(ks[7], (1, dim), dtype)),
                ln_b=(0.1 * jax.random.normal(ks[8], (1, dim), dtype)),
                w1=jax.random.normal(ks[9], (dim, mlp_dim), dtype) / np.sqrt(dim),
                b1=0.1 * jax.random.normal(ks[0], (1, mlp_dim), dtype),
                w2=jax.random.normal(ks[1], (mlp_dim, dim), dtype) / np.sqrt(mlp_dim),
                b2=0.1 * jax.random.normal(ks[2], (1, dim), dtype),
            )
            layers.append((attn_p, ffn_p))
        self.layers = layers

    def __call__(self, x):
        for attn_p, ffn_p in self.layers:
            x = _attn_block(x, attn_p, heads=self.heads, scale=self.scale)
            x = _ffn_block(x, ffn_p)
        return x

    # Pure-JAX reference (same math / same GELU formula), highest-precision matmuls.
    def reference(self, x):
        hp = lax.Precision.HIGHEST
        for ap, fp in self.layers:
            xn = _layernorm(x, ap["ln_g"], ap["ln_b"])
            q = jnp.einsum("bnd,hdk->bhnk", xn, ap["wq"], precision=hp)
            k = jnp.einsum("bnd,hdk->bhnk", xn, ap["wk"], precision=hp)
            v = jnp.einsum("bnd,hdk->bhnk", xn, ap["wv"], precision=hp)
            dots = jnp.einsum("bhnk,bhmk->bhnm", q, k, precision=hp) * self.scale
            attn = jax.nn.softmax(dots, axis=-1)
            o = jnp.einsum("bhnm,bhmk->bhnk", attn, v, precision=hp)
            o = jnp.einsum("bhnk,hkd->bnd", o, ap["wo"], precision=hp) + ap["bo"]
            x = x + o
            xn = _layernorm(x, fp["ln_g"], fp["ln_b"])
            h = jnp.einsum("bnd,dm->bnm", xn, fp["w1"], precision=hp) + fp["b1"]
            h = _gelu_tanh(h)
            y = jnp.einsum("bnm,md->bnd", h, fp["w2"], precision=hp) + fp["b2"]
            x = x + y
        return x


if __name__ == "__main__":
    key = jax.random.PRNGKey(0)
    kx, kp = jax.random.split(key)

    B, N = 2, 8                      # batch, tokens
    dim, depth, heads, dim_head, mlp_dim = 32, 2, 2, 16, 64

    x = jax.random.normal(kx, (B, N, dim), dtype=jnp.float32)
    model = Transformer(dim, depth, heads, dim_head, mlp_dim, dropout=0.0,
                        norm="layer", key=kp)

    out = model(x)
    out = jax.block_until_ready(out)

    ref = jax.block_until_ready(model.reference(x))
    np.testing.assert_allclose(np.asarray(out), np.asarray(ref), rtol=5e-4, atol=5e-4)

    print("KERNEL_OK")
</pallas_src>

<mosaic_0001>
module attributes {stable_mosaic.version = 11 : i64} {
  func.func @_attn_block_kernel(%arg0: i32, %arg1: memref<1x8x32xf32, #tpu.memory_space<vmem>>, %arg2: memref<1x32xf32, #tpu.memory_space<vmem>>, %arg3: memref<1x32xf32, #tpu.memory_space<vmem>>, %arg4: memref<2x32x16xf32, #tpu.memory_space<vmem>>, %arg5: memref<2x32x16xf32, #tpu.memory_space<vmem>>, %arg6: memref<2x32x16xf32, #tpu.memory_space<vmem>>, %arg7: memref<2x16x32xf32, #tpu.memory_space<vmem>>, %arg8: memref<1x32xf32, #tpu.memory_space<vmem>>, %arg9: memref<1x8x32xf32, #tpu.memory_space<vmem>>) attributes {dimension_semantics = [#tpu.dimension_semantics<parallel>], iteration_bounds = array<i64: 2>, scalar_prefetch = 0 : i64, scratch_operands = 0 : i64, tpu.core_type = #tpu.core_type<tc>, window_params = [{transform_indices = @transform_0, window_bounds = array<i64: 1, 8, 32>}, {pipeline_mode = #tpu.pipeline_mode<synchronous>, transform_indices = @transform_1, window_bounds = array<i64: 1, 32>}, {pipeline_mode = #tpu.pipeline_mode<synchronous>, transform_indices = @transform_2, window_bounds = array<i64: 1, 32>}, {pipeline_mode = #tpu.pipeline_mode<synchronous>, transform_indices = @transform_3, window_bounds = array<i64: 2, 32, 16>}, {pipeline_mode = #tpu.pipeline_mode<synchronous>, transform_indices = @transform_4, window_bounds = array<i64: 2, 32, 16>}, {pipeline_mode = #tpu.pipeline_mode<synchronous>, transform_indices = @transform_5, window_bounds = array<i64: 2, 32, 16>}, {pipeline_mode = #tpu.pipeline_mode<synchronous>, transform_indices = @transform_6, window_bounds = array<i64: 2, 16, 32>}, {pipeline_mode = #tpu.pipeline_mode<synchronous>, transform_indices = @transform_7, window_bounds = array<i64: 1, 32>}, {transform_indices = @transform_8, window_bounds = array<i64: 1, 8, 32>}]} {
    %c0 = arith.constant 0 : index
    %c0_0 = arith.constant 0 : index
    %c0_1 = arith.constant 0 : index
    %0 = vector.load %arg1[%c0, %c0_0, %c0_1] : memref<1x8x32xf32, #tpu.memory_space<vmem>>, vector<1x8x32xf32>
    %1 = vector.shape_cast %0 : vector<1x8x32xf32> to vector<8x32xf32>
    %c0_2 = arith.constant 0 : index
    %c0_3 = arith.constant 0 : index
    %2 = vector.load %arg2[%c0_2, %c0_3] : memref<1x32xf32, #tpu.memory_space<vmem>>, vector<1x32xf32>
    %c0_4 = arith.constant 0 : index
    %c0_5 = arith.constant 0 : index
    %3 = vector.load %arg3[%c0_4, %c0_5] : memref<1x32xf32, #tpu.memory_space<vmem>>, vector<1x32xf32>
    %cst = arith.constant dense<0.000000e+00> : vector<8xf32>
    %4 = vector.multi_reduction <add>, %1, %cst [1] : vector<8x32xf32> to vector<8xf32>
    %5 = vector.shape_cast %4 : vector<8xf32> to vector<8x1xf32>
    %cst_6 = arith.constant 3.200000e+01 : f32
    %6 = vector.broadcast %cst_6 : f32 to vector<8x1xf32>
    %7 = arith.divf %5, %6 : vector<8x1xf32>
    %8 = vector.broadcast %7 : vector<8x1xf32> to vector<8x32xf32>
    %9 = arith.subf %1, %8 : vector<8x32xf32>
    %10 = arith.mulf %9, %9 : vector<8x32xf32>
    %cst_7 = arith.constant dense<0.000000e+00> : vector<8xf32>
    %11 = vector.multi_reduction <add>, %10, %cst_7 [1] : vector<8x32xf32> to vector<8xf32>
    %12 = vector.shape_cast %11 : vector<8xf32> to vector<8x1xf32>
    %cst_8 = arith.constant 3.200000e+01 : f32
    %13 = vector.broadcast %cst_8 : f32 to vector<8x1xf32>
    %14 = arith.divf %12, %13 : vector<8x1xf32>
    %cst_9 = arith.constant 9.99999974E-6 : f32
    %15 = vector.broadcast %cst_9 : f32 to vector<8x1xf32>
    %16 = arith.addf %14, %15 : vector<8x1xf32>
    %17 = math.rsqrt %16 : vector<8x1xf32>
    %18 = vector.broadcast %17 : vector<8x1xf32> to vector<8x32xf32>
    %19 = arith.mulf %9, %18 : vector<8x32xf32>
    %20 = vector.broadcast %2 : vector<1x32xf32> to vector<8x32xf32>
    %21 = arith.mulf %19, %20 : vector<8x32xf32>
    %22 = vector.broadcast %3 : vector<1x32xf32> to vector<8x32xf32>
    %23 = arith.addf %21, %22 : vector<8x32xf32>
    %cst_10 = arith.constant 0.000000e+00 : f32
    %24 = vector.broadcast %cst_10 : f32 to vector<8x32xf32>
    %c0_11 = arith.constant 0 : index
    %c0_12 = arith.constant 0 : index
    %c0_13 = arith.constant 0 : index
    %25 = vector.load %arg4[%c0_11, %c0_12, %c0_13] : memref<2x32x16xf32, #tpu.memory_space<vmem>>, vector<1x32x16xf32>
    %26 = vector.shape_cast %25 : vector<1x32x16xf32> to vector<32x16xf32>
    %cst_14 = arith.constant dense<0.000000e+00> : vector<8x16xf32>
    %27 = tpu.matmul %23, %26, %cst_14 {dimension_numbers = #tpu.dot_dimension_numbers<[1], [0], [0], [1], [0, 0, 1, 1], [], []>} : vector<8x32xf32>, vector<32x16xf32>, vector<8x16xf32> -> vector<8x16xf32>
    %c0_15 = arith.constant 0 : index
    %c0_16 = arith.constant 0 : index
    %c0_17 = arith.constant 0 : index
    %28 = vector.load %arg5[%c0_15, %c0_16, %c0_17] : memref<2x32x16xf32, #tpu.memory_space<vmem>>, vector<1x32x16xf32>
    %29 = vector.shape_cast %28 : vector<1x32x16xf32> to vector<32x16xf32>
    %cst_18 = arith.constant dense<0.000000e+00> : vector<8x16xf32>
    %30 = tpu.matmul %23, %29, %cst_18 {dimension_numbers = #tpu.dot_dimension_numbers<[1], [0], [0], [1], [0, 0, 1, 1], [], []>} : vector<8x32xf32>, vector<32x16xf32>, vector<8x16xf32> -> vector<8x16xf32>
    %c0_19 = arith.constant 0 : index
    %c0_20 = arith.constant 0 : index
    %c0_21 = arith.constant 0 : index
    %31 = vector.load %arg6[%c0_19, %c0_20, %c0_21] : memref<2x32x16xf32, #tpu.memory_space<vmem>>, vector<1x32x16xf32>
    %32 = vector.shape_cast %31 : vector<1x32x16xf32> to vector<32x16xf32>
    %cst_22 = arith.constant dense<0.000000e+00> : vector<8x16xf32>
    %33 = tpu.matmul %23, %32, %cst_22 {dimension_numbers = #tpu.dot_dimension_numbers<[1], [0], [0], [1], [0, 0, 1, 1], [], []>} : vector<8x32xf32>, vector<32x16xf32>, vector<8x16xf32> -> vector<8x16xf32>
    %cst_23 = arith.constant dense<0.000000e+00> : vector<8x8xf32>
    %34 = tpu.matmul %27, %30, %cst_23 {dimension_numbers = #tpu.dot_dimension_numbers<[1], [1], [0], [0], [0, 0, 1, 0], [], []>} : vector<8x16xf32>, vector<8x16xf32>, vector<8x8xf32> -> vector<8x8xf32>
    %cst_24 = arith.constant 2.500000e-01 : f32
    %35 = vector.broadcast %cst_24 : f32 to vector<8x8xf32>
    %36 = arith.mulf %34, %35 : vector<8x8xf32>
    %cst_25 = arith.constant dense<0xFF800000> : vector<8xf32>
    %37 = vector.multi_reduction <maximumf>, %36, %cst_25 [1] : vector<8x8xf32> to vector<8xf32>
    %38 = vector.shape_cast %37 : vector<8xf32> to vector<8x1xf32>
    %39 = vector.broadcast %38 : vector<8x1xf32> to vector<8x8xf32>
    %40 = arith.subf %36, %39 : vector<8x8xf32>
    %41 = math.exp %40 : vector<8x8xf32>
    %cst_26 = arith.constant dense<0.000000e+00> : vector<8xf32>
    %42 = vector.multi_reduction <add>, %41, %cst_26 [1] : vector<8x8xf32> to vector<8xf32>
    %43 = vector.shape_cast %42 : vector<8xf32> to vector<8x1xf32>
    %44 = vector.broadcast %43 : vector<8x1xf32> to vector<8x8xf32>
    %45 = arith.divf %41, %44 : vector<8x8xf32>
    %cst_27 = arith.constant dense<0.000000e+00> : vector<8x16xf32>
    %46 = tpu.matmul %45, %33, %cst_27 {dimension_numbers = #tpu.dot_dimension_numbers<[1], [0], [0], [1], [0, 0, 1, 1], [], []>} : vector<8x8xf32>, vector<8x16xf32>, vector<8x16xf32> -> vector<8x16xf32>
    %c0_28 = arith.constant 0 : index
    %c0_29 = arith.constant 0 : index
    %c0_30 = arith.constant 0 : index
    %47 = vector.load %arg7[%c0_28, %c0_29, %c0_30] : memref<2x16x32xf32, #tpu.memory_space<vmem>>, vector<1x16x32xf32>
    %48 = vector.shape_cast %47 : vector<1x16x32xf32> to vector<16x32xf32>
    %cst_31 = arith.constant dense<0.000000e+00> : vector<8x32xf32>
    %49 = tpu.matmul %46, %48, %cst_31 {dimension_numbers = #tpu.dot_dimension_numbers<[1], [0], [0], [1], [0, 0, 1, 1], [], []>} : vector<8x16xf32>, vector<16x32xf32>, vector<8x32xf32> -> vector<8x32xf32>
    %50 = arith.addf %24, %49 : vector<8x32xf32>
    %c1 = arith.constant 1 : index
    %c0_32 = arith.constant 0 : index
    %c0_33 = arith.constant 0 : index
    %51 = vector.load %arg4[%c1, %c0_32, %c0_33] : memref<2x32x16xf32, #tpu.memory_space<vmem>>, vector<1x32x16xf32>
    %52 = vector.shape_cast %51 : vector<1x32x16xf32> to vector<32x16xf32>
    %cst_34 = arith.constant dense<0.000000e+00> : vector<8x16xf32>
    %53 = tpu.matmul %23, %52, %cst_34 {dimension_numbers = #tpu.dot_dimension_numbers<[1], [0], [0], [1], [0, 0, 1, 1], [], []>} : vector<8x32xf32>, vector<32x16xf32>, vector<8x16xf32> -> vector<8x16xf32>
    %c1_35 = arith.constant 1 : index
    %c0_36 = arith.constant 0 : index
    %c0_37 = arith.constant 0 : index
    %54 = vector.load %arg5[%c1_35, %c0_36, %c0_37] : memref<2x32x16xf32, #tpu.memory_space<vmem>>, vector<1x32x16xf32>
    %55 = vector.shape_cast %54 : vector<1x32x16xf32> to vector<32x16xf32>
    %cst_38 = arith.constant dense<0.000000e+00> : vector<8x16xf32>
    %56 = tpu.matmul %23, %55, %cst_38 {dimension_numbers = #tpu.dot_dimension_numbers<[1], [0], [0], [1], [0, 0, 1, 1], [], []>} : vector<8x32xf32>, vector<32x16xf32>, vector<8x16xf32> -> vector<8x16xf32>
    %c1_39 = arith.constant 1 : index
    %c0_40 = arith.constant 0 : index
    %c0_41 = arith.constant 0 : index
    %57 = vector.load %arg6[%c1_39, %c0_40, %c0_41] : memref<2x32x16xf32, #tpu.memory_space<vmem>>, vector<1x32x16xf32>
    %58 = vector.shape_cast %57 : vector<1x32x16xf32> to vector<32x16xf32>
    %cst_42 = arith.constant dense<0.000000e+00> : vector<8x16xf32>
    %59 = tpu.matmul %23, %58, %cst_42 {dimension_numbers = #tpu.dot_dimension_numbers<[1], [0], [0], [1], [0, 0, 1, 1], [], []>} : vector<8x32xf32>, vector<32x16xf32>, vector<8x16xf32> -> vector<8x16xf32>
    %cst_43 = arith.constant dense<0.000000e+00> : vector<8x8xf32>
    %60 = tpu.matmul %53, %56, %cst_43 {dimension_numbers = #tpu.dot_dimension_numbers<[1], [1], [0], [0], [0, 0, 1, 0], [], []>} : vector<8x16xf32>, vector<8x16xf32>, vector<8x8xf32> -> vector<8x8xf32>
    %cst_44 = arith.constant 2.500000e-01 : f32
    %61 = vector.broadcast %cst_44 : f32 to vector<8x8xf32>
    %62 = arith.mulf %60, %61 : vector<8x8xf32>
    %cst_45 = arith.constant dense<0xFF800000> : vector<8xf32>
    %63 = vector.multi_reduction <maximumf>, %62, %cst_45 [1] : vector<8x8xf32> to vector<8xf32>
    %64 = vector.shape_cast %63 : vector<8xf32> to vector<8x1xf32>
    %65 = vector.broadcast %64 : vector<8x1xf32> to vector<8x8xf32>
    %66 = arith.subf %62, %65 : vector<8x8xf32>
    %67 = math.exp %66 : vector<8x8xf32>
    %cst_46 = arith.constant dense<0.000000e+00> : vector<8xf32>
    %68 = vector.multi_reduction <add>, %67, %cst_46 [1] : vector<8x8xf32> to vector<8xf32>
    %69 = vector.shape_cast %68 : vector<8xf32> to vector<8x1xf32>
    %70 = vector.broadcast %69 : vector<8x1xf32> to vector<8x8xf32>
    %71 = arith.divf %67, %70 : vector<8x8xf32>
    %cst_47 = arith.constant dense<0.000000e+00> : vector<8x16xf32>
    %72 = tpu.matmul %71, %59, %cst_47 {dimension_numbers = #tpu.dot_dimension_numbers<[1], [0], [0], [1], [0, 0, 1, 1], [], []>} : vector<8x8xf32>, vector<8x16xf32>, vector<8x16xf32> -> vector<8x16xf32>
    %c1_48 = arith.constant 1 : index
    %c0_49 = arith.constant 0 : index
    %c0_50 = arith.constant 0 : index
    %73 = vector.load %arg7[%c1_48, %c0_49, %c0_50] : memref<2x16x32xf32, #tpu.memory_space<vmem>>, vector<1x16x32xf32>
    %74 = vector.shape_cast %73 : vector<1x16x32xf32> to vector<16x32xf32>
    %cst_51 = arith.constant dense<0.000000e+00> : vector<8x32xf32>
    %75 = tpu.matmul %72, %74, %cst_51 {dimension_numbers = #tpu.dot_dimension_numbers<[1], [0], [0], [1], [0, 0, 1, 1], [], []>} : vector<8x16xf32>, vector<16x32xf32>, vector<8x32xf32> -> vector<8x32xf32>
    %76 = arith.addf %50, %75 : vector<8x32xf32>
    %77 = arith.addf %1, %76 : vector<8x32xf32>
    %c0_52 = arith.constant 0 : index
    %c0_53 = arith.constant 0 : index
    %78 = vector.load %arg8[%c0_52, %c0_53] : memref<1x32xf32, #tpu.memory_space<vmem>>, vector<1x32xf32>
    %79 = vector.broadcast %78 : vector<1x32xf32> to vector<8x32xf32>
    %80 = arith.addf %77, %79 : vector<8x32xf32>
    %c0_54 = arith.constant 0 : index
    %c0_55 = arith.constant 0 : index
    %c0_56 = arith.constant 0 : index
    %81 = vector.load %arg9[%c0_54, %c0_55, %c0_56] : memref<1x8x32xf32, #tpu.memory_space<vmem>>, vector<1x8x32xf32>
    %82 = vector.shape_cast %81 : vector<1x8x32xf32> to vector<8x32xf32>
    %83 = vector.shape_cast %80 : vector<8x32xf32> to vector<1x8x32xf32>
    tpu.vector_store %arg9[%c0_54, %c0_55, %c0_56], %83 {strides = array<i32>} : memref<1x8x32xf32, #tpu.memory_space<vmem>>, vector<1x8x32xf32>,
    return
  }
  func.func @transform_0(%arg0: i32) -> (i32, i32, i32) {
    %c0_i32 = arith.constant 0 : i32
    %c0_i32_0 = arith.constant 0 : i32
    %c0_i32_1 = arith.constant 0 : i32
    return %arg0, %c0_i32, %c0_i32_0 : i32, i32, i32
  }
  func.func @transform_1(%arg0: i32) -> (i32, i32) {
    %c0_i32 = arith.constant 0 : i32
    %c0_i32_0 = arith.constant 0 : i32
    %c0_i32_1 = arith.constant 0 : i32
    return %c0_i32, %c0_i32_0 : i32, i32
  }
  func.func @transform_2(%arg0: i32) -> (i32, i32) {
    %c0_i32 = arith.constant 0 : i32
    %c0_i32_0 = arith.constant 0 : i32
    %c0_i32_1 = arith.constant 0 : i32
    return %c0_i32, %c0_i32_0 : i32, i32
  }
  func.func @transform_3(%arg0: i32) -> (i32, i32, i32) {
    %c0_i32 = arith.constant 0 : i32
    %c0_i32_0 = arith.constant 0 : i32
    %c0_i32_1 = arith.constant 0 : i32
    %c0_i32_2 = arith.constant 0 : i32
    return %c0_i32, %c0_i32_0, %c0_i32_1 : i32, i32, i32
  }
  func.func @transform_4(%arg0: i32) -> (i32, i32, i32) {
    %c0_i32 = arith.constant 0 : i32
    %c0_i32_0 = arith.constant 0 : i32
    %c0_i32_1 = arith.constant 0 : i32
    %c0_i32_2 = arith.constant 0 : i32
    return %c0_i32, %c0_i32_0, %c0_i32_1 : i32, i32, i32
  }
  func.func @transform_5(%arg0: i32) -> (i32, i32, i32) {
    %c0_i32 = arith.constant 0 : i32
    %c0_i32_0 = arith.constant 0 : i32
    %c0_i32_1 = arith.constant 0 : i32
    %c0_i32_2 = arith.constant 0 : i32
    return %c0_i32, %c0_i32_0, %c0_i32_1 : i32, i32, i32
  }
  func.func @transform_6(%arg0: i32) -> (i32, i32, i32) {
    %c0_i32 = arith.constant 0 : i32
    %c0_i32_0 = arith.constant 0 : i32
    %c0_i32_1 = arith.constant 0 : i32
    %c0_i32_2 = arith.constant 0 : i32
    return %c0_i32, %c0_i32_0, %c0_i32_1 : i32, i32, i32
  }
  func.func @transform_7(%arg0: i32) -> (i32, i32) {
    %c0_i32 = arith.constant 0 : i32
    %c0_i32_0 = arith.constant 0 : i32
    %c0_i32_1 = arith.constant 0 : i32
    return %c0_i32, %c0_i32_0 : i32, i32
  }
  func.func @transform_8(%arg0: i32) -> (i32, i32, i32) {
    %c0_i32 = arith.constant 0 : i32
    %c0_i32_0 = arith.constant 0 : i32
    %c0_i32_1 = arith.constant 0 : i32
    return %arg0, %c0_i32, %c0_i32_0 : i32, i32, i32
  }
}

</mosaic_0001>

<bundles_post_ra>
// kernel: tpu_custom_call.1
= control target key start
LH: loop header
LB: loop body
LE: loop exit
PB: predicated region body
PF: predicated region fallthrough
CT: control target
= control target key end

     0   :  { %13 = vsyncpa [#allocation3], 0  ;;  %s2002_s0 = inlined_call_operand.vmem [shape: f32[2,8,32], index: 0, kind: input, shape index: {}]   ;;  %s2003_s1 = inlined_call_operand.vmem [shape: f32[1,32], index: 1, kind: input, shape index: {}]   ;;  %s2004_s2 = inlined_call_operand.vmem [shape: f32[1,32], index: 2, kind: input, shape index: {}]   ;;  %s2005_s3 = inlined_call_operand.vmem [shape: f32[2,32,16], index: 3, kind: input, shape index: {}]   ;;  %s2006_s4 = inlined_call_operand.vmem [shape: f32[2,32,16], index: 4, kind: input, shape index: {}]   ;;  %s2007_s5 = inlined_call_operand.vmem [shape: f32[2,32,16], index: 5, kind: input, shape index: {}]   ;;  %s2008_s6 = inlined_call_operand.vmem [shape: f32[2,16,32], index: 6, kind: input, shape index: {}]   ;;  %s2009_s7 = inlined_call_operand.vmem [shape: f32[1,32], index: 7, kind: input, shape index: {}]   ;;  %s2010_s8 = inlined_call_operand.hbm [shape: f32[2,8,32], index: 8, kind: output, shape index: {}]  }
   0x1   :  { %15 = vsyncpa [#allocation3 + $0x1], 0  ;;  %s1733_s27 = smov 0   ;;  %s1735_s28 = smov 0  }
   0x2   :  { %s1737_s29 = smov 0   ;;  %s1739_s30 = smov 0  }
   0x3 LB: > { %s1754_s9 = sadd.s32 4294967295, %s1682_s30   ;;  %s1341_s10 = sadd.s32 4294967294, %s1682_s30   ;;  %s1682_s30 = sphi %s1739_s30, %s2016_s30   ;;  %s1678_s29 = sphi %s1737_s29, %s2015_s29   ;;  %s1674_s28 = sphi %s1735_s28, %s2014_s28   ;;  %s1670_s27 = sphi %s1733_s27, %s2013_s27  }
   0x4   : > { %s1758_s11 = sadd.s32 1, %s1682_s30   ;;  %s201_s12 = sadd.s32 1, %s1678_s29 }
   0x5   : > { %s198_s13 = ssub.s32 %s1682_s30, %s1758_s11  ;;  %p211_p0 = scmp.ne.s32.totalorder %s1678_s29, %s1674_s28 }
   0x6   : > { %p199_p1 = scmp.eq.s32.totalorder %s198_s13, 0  ;;  %p212_p2 = scmp.eq.s32.totalorder %s1754_s9, 1 }
   0x7   : > { %p217_p3 = scmp.ne.s32.totalorder %s1674_s28, %s1670_s27  ;;  %p218_p4 = scmp.eq.s32.totalorder %s1341_s10, 1 }
   0x8   : > { %s1769_s14 = scalar_select %p199_p1, %s1678_s29, %s201_s12  }
   0x9   : > { %p1771_p5 = por %p212_p2, %p211_p0  ;;  %p1775_p6 = por %p218_p4, %p217_p3 }
   0xa   : > { %p1344_p7 = scmp.ge.s32.totalorder %s1682_s30, 1  ;;  %p264_p8 = scmp.lt.s32.totalorder %s1682_s30, 3 }
   0xc   : > { %p265_p9 = pnand %p1344_p7, %p264_p8 }
   0xd   : > { %p297_p10 = scmp.lt.s32.totalorder (!%p265_p9), %s1754_s9, 1  ;;  %vm304_vm0 = vcmask (!%p265_p9), 261120   ;;  %v333_v7 = vld [vmem:[%s2005_s3] sm:$0xff] (!%p265_p9)  ;;  %v334_v8 = vld [vmem:[%s2005_s3 + $0x8] sm:$0xff] (!%p265_p9)  ;;  %v1684_v12 = vmov (!%p265_p9), 0.0|0.0   ;;  %v335_v14 = vld [vmem:[%s2005_s3 + $0x10] sm:$0xff] (!%p265_p9) }
   0xe   : > { %268 = sbr.rel (%p265_p9) target bundleno = 2277 (0x8e5), region = 52  ;;  %v1527_v9 = vpack.c.bf16 (!%p265_p9), %v334_v8, %v333_v7  ;;  %v410_v10 = vld [vmem:[%s2006_s4] sm:$0xff] (!%p265_p9)  ;;  %v411_v11 = vld [vmem:[%s2006_s4 + $0x8] sm:$0xff] (!%p265_p9)  ;;  %1526 = vmatprep.subr.bf16.mxu0 (!%p265_p9), %v1684_v12  ;;  %1532 = vmatprep.subr.bf16.mxu1 (!%p265_p9), %v1684_v12  ;;  %v336_v15 = vld [vmem:[%s2005_s3 + $0x18] sm:$0xff] (!%p265_p9)  ;;  %vm1685_vm1 = vmmov (!%p265_p9), 0   ;;  %v1686_v20 = vmov (!%p265_p9), 0.0  }
   0xf   : > { %v1533_v13 = vpack.c.bf16 (!%p265_p9), %v411_v11, %v410_v10  ;;  %v1530_v16 = vpack.c.bf16 (!%p265_p9), %v336_v15, %v335_v14  ;;  %v412_v17 = vld [vmem:[%s2006_s4 + $0x10] sm:$0xff] (!%p265_p9)  ;;  %v413_v18 = vld [vmem:[%s2006_s4 + $0x18] sm:$0xff] (!%p265_p9)  ;;  %1434 = vmatprep.mubr.msk.f32.mxu0 (!%p265_p9), %vm1685_vm1, %v1686_v20  ;;  %1445 = vmatprep.mubr.msk.f32.mxu1 (!%p265_p9), %vm1685_vm1, %v1686_v20  ;;  %v1347_v25 = vld [vmem:[%s2003_s1] ss:$0 sm:$0xff] (!%p265_p9)  ;;  %vm558_vm2 = vcmask (!%p265_p9), 130048   ;;  %vm636_vm3 = vcmask (!%p265_p9), 64512  }
  0x10   : > { %1528 = vmatpush3.bf16.msra.mxu0 (!%p265_p9), %v1527_v9  ;;  %v1536_v19 = vpack.c.bf16 (!%p265_p9), %v413_v18, %v412_v17  ;;  %v484_v27 = vld [vmem:[%s2007_s5] sm:$0xff] (!%p265_p9)  ;;  %v485_v28 = vld [vmem:[%s2007_s5 + $0x8] sm:$0xff] (!%p265_p9)  ;;  %v486_v33 = vld [vmem:[%s2007_s5 + $0x10] sm:$0xff] (!%p265_p9) }
  0x11   : > { %1534 = vmatpush3.bf16.msra.mxu1 (!%p265_p9), %v1533_v13  ;;  %1529 = vmatprep.subr.bf16.mxu0 (!%p265_p9), %v1684_v12  ;;  %v1348_v29 = vld [vmem:[%s2004_s2] ss:$0 sm:$0xff] (!%p265_p9)  ;;  %v1539_v31 = vpack.c.bf16 (!%p265_p9), %v485_v28, %v484_v27  ;;  %v487_v34 = vld [vmem:[%s2007_s5 + $0x18] sm:$0xff] (!%p265_p9)  ;;  %v1356_v37 = vld [vmem:[%s2005_s3 + $0x28] sm:$0xff] (!%p265_p9) }
  0x12   : > { %1535 = vmatprep.subr.bf16.mxu1 (!%p265_p9), %v1684_v12  ;;  %v1542_v35 = vpack.c.bf16 (!%p265_p9), %v487_v34, %v486_v33  ;;  %v1355_v36 = vld [vmem:[%s2005_s3 + $0x20] sm:$0xff] (!%p265_p9)  ;;  %v1357_v39 = vld [vmem:[%s2005_s3 + $0x30] sm:$0xff] (!%p265_p9)  ;;  %v1358_v40 = vld [vmem:[%s2005_s3 + $0x38] sm:$0xff] (!%p265_p9) }
  0x13   : > { %v1545_v38 = vpack.c.bf16 (!%p265_p9), %v1356_v37, %v1355_v36  ;;  %v1548_v41 = vpack.c.bf16 (!%p265_p9), %v1358_v40, %v1357_v39  ;;  %v1365_v42 = vld [vmem:[%s2007_s5 + $0x20] sm:$0xff] (!%p265_p9)  ;;  %v1366_v43 = vld [vmem:[%s2007_s5 + $0x28] sm:$0xff] (!%p265_p9)  ;;  %v1367_v45 = vld [vmem:[%s2007_s5 + $0x30] sm:$0xff] (!%p265_p9) }
  0x14   : > { %1531 = vmatpush3.bf16.msra.mxu0 (!%p265_p9), %v1530_v16  ;;  %v1557_v44 = vpack.c.bf16 (!%p265_p9), %v1366_v43, %v1365_v42  ;;  %v1368_v46 = vld [vmem:[%s2007_s5 + $0x38] sm:$0xff] (!%p265_p9)  ;;  %v1362_v10 = vld [vmem:[%s2006_s4 + $0x30] sm:$0xff] (!%p265_p9)  ;;  %v1377_v43 = vld [vmem:[%s2009_s7] ss:$0 sm:$0xff] (!%p265_p9) }
  0x15   : > { %s298_s17 = scalar_select %p297_p10, %s1754_s9, 1  ;;  %1537 = vmatpush3.bf16.msra.mxu1 %v1536_v19  ;;  %1538 = vmatprep.subr.bf16.mxu0 %v1684_v12  ;;  %v1560_v47 = vpack.c.bf16 %v1368_v46, %v1367_v45  ;;  %v1363_v11 = vld [vmem:[%s2006_s4 + $0x38] sm:$0xff]  ;;  %v1373_v28 = vld [vmem:[%s2008_s6 + $0x10] sm:$0xff] }
  0x16   : > { %1459 = vmatprep.subr.mxu1 %v1686_v20  ;;  %v1554_v13 = vpack.c.bf16 %v1363_v11, %v1362_v10 }
  0x17   : > { %s1346_s18 = sshll.u32 %s298_s17, 3  ;;  %s294_s17 = sand.u32 1, %s1674_s28  }
  0x18   : > { %s300_s21 = scalar_lea.vmem %s2002_s0, %s1346_s18  ;;  %s1345_s18 = sshll.u32 %s294_s17, 3 }
  0x19   : > { %v1786_v0 = vld [vmem:[%s300_s21] sm:$0xff]  ;;  %s1379_s21 = sshll.u32 %s1754_s9, 7  ;;  %s296_s22 = scalar_lea.vmem [#allocation2], %s1345_s18 }
  0x1a   : > { %v305_v1 = vsel %vm304_vm0, %v1786_v0, 0.0  ;;  %s1282_s23 = sshll.u32 %s296_s22, 4  ;;  %s1959_s26 = scalar_lea.hbm %s2010_s8, %s1379_s21  ;;  %s1961_s23 = int_to_ptr.vmem [resolvable:$true] %s1282_s23 }
  0x1b   : > { %306 = vadd.xlane.f32.xlu0 %v305_v1  ;;  %s1269_s10 = scalar_lea.sflag [#allocation3], %s294_s17  ;;  %s1620_s12 = scalar_lea.vmem %s1961_s23, 128 }
  0x1c   : > { %p1621_p11 = scmp.ne.s32.totalorder %s1961_s23, %s1620_s12  ;;  %s1687_s9 = smov [#allocation2]  }
  0x1d   : > { %s1624_s13 = sshll.u32 %s1687_s9, 4  ;;  %s1625_s13 = int_to_ptr.vmem [resolvable:$false] %s1624_s13 }
  0x1e   : > { %p1622_p12 = pnand %p1621_p11, %p1771_p5  ;;  %s1626_s18 = scalar_lea.vmem %s1625_s13, 256 }
  0x1f   : > { %p1627_p0 = scmp.lt.s32.totalorder %s1961_s23, %s1625_s13  ;;  %p1628_p1 = scmp.lt.s32.totalorder %s1626_s18, %s1620_s12 }
  0x20   : > { %p1623_p13 = pneg %p1622_p12 }
  0x21   : > { %p1629_p2 = por %p1628_p1, %p1627_p0 }
  0x23   : > { %p1630_p3 = pnand %p1629_p2, %p1623_p13 }
  0xa8   : > { %v307_v2 = vpop.xlane.xlu0 %306 }
  0xa9   : > { %v309_v3 = vmul.f32 0.03125, %v307_v2 }
  0xab   : > { %v310_v4 = vsub.f32 %v1786_v0, %v309_v3 }
  0xad   : > { %v311_v5 = vmul.f32 %v310_v4, %v310_v4 }
  0xaf   : > { %v312_v6 = vsel %vm304_vm0, %v311_v5, 0.0  ;;  %v1360_v5 = vld [vmem:[%s2006_s4 + $0x20] sm:$0xff] }
  0xb0   : > { %313 = vadd.xlane.f32.xlu0 %v312_v6  ;;  %v1361_v6 = vld [vmem:[%s2006_s4 + $0x28] sm:$0xff] }
  0xb1   : > { %v1551_v8 = vpack.c.bf16 %v1361_v6, %v1360_v5 }
 0x13d   : > { %v314_v21 = vpop.xlane.xlu0 %313 }
 0x13e   : > { %v315_v22 = vmul.f32 0.03125, %v314_v21 }
 0x140   : > { %v316_v23 = vadd.f32 1e-05, %v315_v22 }
 0x142   : > { %1610 = vrsqrt.f32 %v316_v23 }
 0x14c   : > { %v1611_v24 = vpop.eup %1610 }
 0x14d   : > { %v318_v26 = vmul.f32 %v1611_v24, %v310_v4 }
 0x14f   : > { %v325_v30 = vmul.f32 %v1347_v25, %v318_v26 }
 0x151   : > { %v1838_v32 = vadd.f32 %v1348_v29, %v325_v30 }
 0x153   : > { %1435 = vmatmul.mubr.msk.f32.vlgmr.msra.gmra.mrb[0].mxu0 %vm304_vm0, %v1838_v32  ;;  %1446 = vmatmul.mubr.msk.f32.vlgmr.msra.gmra.mrb[0].mxu1 %vm304_vm0, %v1838_v32 }
 0x154   : > { %1540 = vmatpush3.bf16.msra.mxu0 %v1539_v31  ;;  %1456 = vmatprep.mubr.msk.f32.mxu0 %vm1685_vm1, %v1686_v20  ;;  %v721_v31 = vld [vmem:[%s2008_s6] sm:$0xff] }
 0x155   : > { %1541 = vmatprep.subr.bf16.mxu0 %v1684_v12  ;;  %1461 = vmatprep.mubr.msk.f32.mxu1 %vm1685_vm1, %v1686_v20 }
 0x158   : > { %1543 = vmatpush3.bf16.msra.mxu0 %v1542_v35 }
 0x159   : > { %1544 = vmatprep.subr.bf16.mxu0 %v1684_v12 }
 0x15b   : > { %1457 = vmatmul.mubr.msk.f32.vlgmr.msra.gmra.mrb[2].mxu0 %vm304_vm0, %v1838_v32 }
 0x15c   : > { %1546 = vmatpush3.bf16.msra.mxu0 %v1545_v38  ;;  %1477 = vmatprep.mubr.msk.f32.mxu0 %vm1685_vm1, %v1686_v20 }
 0x15d   : > { %1547 = vmatprep.subr.bf16.mxu0 %v1684_v12 }
 0x160   : > { %1549 = vmatpush3.bf16.msra.mxu0 %v1548_v41 }
 0x161   : > { %1556 = vmatprep.subr.bf16.mxu0 %v1684_v12 }
 0x163   : > { %1478 = vmatmul.mubr.msk.f32.vlgmr.msra.gmra.mrb[4].mxu0 %vm304_vm0, %v1838_v32 }
 0x164   : > { %1558 = vmatpush3.bf16.msra.mxu0 %v1557_v44  ;;  %1499 = vmatprep.mubr.msk.f32.mxu0 %vm1685_vm1, %v1686_v20 }
 0x165   : > { %1559 = vmatprep.subr.bf16.mxu0 %v1684_v12 }
 0x168   : > { %1561 = vmatpush3.bf16.msra.mxu0 %v1560_v47 }
 0x169   : > { %1562 = vmatprep.subr.bf16.mxu0 %v1684_v12 }
 0x16b   : > { %1500 = vmatmul.mubr.msk.f32.vlgmr.msra.gmra.mrb[6].mxu0 %vm304_vm0, %v1838_v32 }
 0x16c   : > { %1516 = vmatprep.mubr.msk.f32.mxu0 %vm1685_vm1, %v1686_v20 }
 0x226   : > { %v406_v48 = vpop.f32.mrb[0].mxu0  ;;  %v480_v49 = vpop.f32.mrb[0].mxu1 }
 0x227   : > { %v1436_v50 = vpop.f32.mrb[1].mxu0  ;;  %v1447_v51 = vpop.f32.mrb[1].mxu1  ;;  %1460 = vmatpush3.xpose.msk.msra.mxu1 %vm558_vm2, %v480_v49 }
 0x228   : > { %1464 = vmatprep.subr.mxu1 %v1686_v20 }
 0x22a   : > { %1462 = vmatmul.mubr.msk.f32.vlgmr.msra.gmra.mrb[2].mxu1 %vm558_vm2, %v406_v48 }
 0x22b   : > { %1466 = vmatprep.mubr.msk.f32.mxu1 %vm1685_vm1, %v1686_v20 }
 0x22e   : > { %v554_v52 = vpop.f32.mrb[2].mxu0 }
 0x22f   : > { %v1458_v53 = vpop.f32.mrb[3].mxu0  ;;  %1465 = vmatpush3.msra.mxu1 %v554_v52 }
 0x230   : > { %1550 = vmatprep.subr.bf16.mxu1 %v1684_v12 }
 0x236   : > { %v794_v54 = vpop.f32.mrb[4].mxu0 }
 0x237   : > { %v1479_v55 = vpop.f32.mrb[5].mxu0 }
 0x23e   : > { %v944_v56 = vpop.f32.mrb[6].mxu0 }
 0x23f   : > { %v1501_v57 = vpop.f32.mrb[7].mxu0 }
 0x2fd   : > { %v631_v58 = vpop.f32.mrb[2].mxu1 }
 0x2fe   : > { %v635_v59 = vmul.f32 0.25, %v631_v58  ;;  %v1463_v60 = vpop.f32.mrb[3].mxu1 }
 0x300   : > { %v637_v61 = vsel %vm636_vm3, %v635_v59, -inf }
 0x301   : > { %638 = vmax.xlane.f32.xlu1 %v637_v61 }
 0x38e   : > { %v639_v62 = vpop.xlane.xlu1 %638 }
 0x38f   : > { %v640_v63 = vsub.f32 %v635_v59, %v639_v62 }
 0x391   : > { %v641_v1 = vmul.f32 1.442695, %v640_v63 }
 0x393   : > { %1612 = vpow2.f32 %v641_v1 }
 0x39d   : > { %v1613_v2 = vpop.eup %1612 }
 0x39e   : > { %v643_v3 = vsel %vm636_vm3, %v1613_v2, 0.0 }
 0x39f   : > { %644 = vadd.xlane.f32.xlu1 %v643_v3 }
 0x42c   : > { %v645_v4 = vpop.xlane.xlu1 %644 }
 0x42d   : > { %1614 = vrcp.f32 %v645_v4 }
 0x437   : > { %v1615_v7 = vpop.eup %1614 }
 0x438   : > { %v647_v9 = vmul.f32 %v1615_v7, %v1613_v2 }
 0x43a   : > { %1467 = vmatmul.mubr.msk.f32.vlgmr.msra.gmra.mrb[4].mxu1 %vm636_vm3, %v647_v9 }
 0x43b   : > { %1552 = vmatpush3.bf16.msra.mxu1 %v1551_v8  ;;  %1488 = vmatprep.mubr.msk.f32.mxu1 %vm1685_vm1, %v1686_v20 }
 0x43c   : > { %1553 = vmatprep.subr.bf16.mxu1 %v1684_v12 }
 0x43f   : > { %1555 = vmatpush3.bf16.msra.mxu1 %v1554_v13 }
 0x440   : > { %1502 = vmatprep.subr.mxu1 %v1686_v20 }
 0x442   : > { %1489 = vmatmul.mubr.msk.f32.vlgmr.msra.gmra.mrb[6].mxu1 %vm304_vm0, %v1838_v32  ;;  %v722_v32 = vld [vmem:[%s2008_s6 + $0x8] sm:$0xff] }
 0x443   : > { %1504 = vmatprep.mubr.msk.f32.mxu1 %vm1685_vm1, %v1686_v20  ;;  %v1566_v34 = vpack.c.bf16 %v722_v32, %v721_v31 }
 0x50d   : > { %v717_v14 = vpop.f32.mrb[4].mxu1 }
 0x50e   : > { %v1468_v15 = vpop.f32.mrb[5].mxu1 }
 0x515   : > { %v869_v16 = vpop.f32.mrb[6].mxu1 }
 0x516   : > { %v1490_v17 = vpop.f32.mrb[7].mxu1  ;;  %1503 = vmatpush3.xpose.msk.msra.mxu1 %vm558_vm2, %v869_v16 }
 0x517   : > { %1507 = vmatprep.subr.mxu1 %v1686_v20 }
 0x519   : > { %1505 = vmatmul.mubr.msk.f32.vlgmr.msra.gmra.mrb[8].mxu1 %vm558_vm2, %v794_v54 }
 0x51a   : > { %1508 = vmatpush3.msra.mxu1 %v944_v56  ;;  %1509 = vmatprep.mubr.msk.f32.mxu1 %vm1685_vm1, %v1686_v20 }
 0x51b   : > { %1565 = vmatprep.subr.bf16.mxu1 %v1684_v12  ;;  %v1374_v12 = vld [vmem:[%s2008_s6 + $0x18] sm:$0xff] }
 0x51c   : > { %v1563_v29 = vpack.c.bf16 %v1374_v12, %v1373_v28 }
 0x51e   : > { %1564 = vmatpush3.bf16.msra.mxu0 %v1563_v29 }
 0x5ec   : > { %v1020_v18 = vpop.f32.mrb[8].mxu1 }
 0x5ed   : > { %v1024_v19 = vmul.f32 0.25, %v1020_v18  ;;  %v1506_v21 = vpop.f32.mrb[9].mxu1 }
 0x5ef   : > { %v1025_v22 = vsel %vm636_vm3, %v1024_v19, -inf }
 0x5f0   : > { %1026 = vmax.xlane.f32.xlu0 %v1025_v22 }
 0x67d   : > { %v1027_v23 = vpop.xlane.xlu0 %1026 }
 0x67e   : > { %v1028_v24 = vsub.f32 %v1024_v19, %v1027_v23 }
 0x680   : > { %v1029_v25 = vmul.f32 1.442695, %v1028_v24 }
 0x682   : > { %1616 = vpow2.f32 %v1029_v25 }
 0x68c   : > { %v1617_v26 = vpop.eup %1616 }
 0x68d   : > { %v1031_v27 = vsel %vm636_vm3, %v1617_v26, 0.0 }
 0x68e   : > { %1032 = vadd.xlane.f32.xlu1 %v1031_v27 }
 0x71b   : > { %v1033_v30 = vpop.xlane.xlu1 %1032 }
 0x71c   : > { %1618 = vrcp.f32 %v1033_v30 }
 0x726   : > { %v1619_v33 = vpop.eup %1618 }
 0x727   : > { %v1035_v35 = vmul.f32 %v1619_v33, %v1617_v26 }
 0x729   : > { %1510 = vmatmul.mubr.msk.f32.vlgmr.msra.gmra.mrb[10].mxu1 %vm636_vm3, %v1035_v35 }
 0x72a   : > { %1567 = vmatpush3.bf16.msra.mxu1 %v1566_v34  ;;  %1523 = vmatprep.mubr.msk.f32.mxu1 %vm1685_vm1, %v1686_v20 }
 0x72d   : > { %1524 = vmatmul.mubr.msk.f32.vlgmr.msra.gmra.mrb[12].mxu1 %vm558_vm2, %v717_v14 }
 0x7fc   : > { %v1105_v36 = vpop.f32.mrb[10].mxu1 }
 0x7fd   : > { %v1511_v37 = vpop.f32.mrb[11].mxu1  ;;  %1517 = vmatmul.mubr.msk.f32.vlgmr.msra.gmra.mrb[8].mxu0 %vm558_vm2, %v1105_v36 }
 0x800   : > { %v1254_v38 = vpop.f32.mrb[12].mxu1 }
 0x801   : > { %v1525_v39 = vpop.f32.mrb[13].mxu1 }
 0x8d0   : > { %v1181_v40 = vpop.f32.mrb[8].mxu0 }
 0x8d1   : > { %v1255_v41 = vadd.f32 %v1254_v38, %v1181_v40  ;;  %v1518_v42 = vpop.f32.mrb[9].mxu0 }
 0x8d3   : > { %v1258_v20 = vadd.f32 %v1255_v41, %v1786_v0 }
 0x8d5   : > { %v1266_v44 = vadd.f32 %v1377_v43, %v1258_v20 }
 0x8d7   : > { %1267 = vst.msk [vmem:[%s296_s22] sm:$0xff] %vm304_vm0, %v1266_v44 }
 0x8d8   : > { %1633 = shalt.err (!%p1630_p3)
}
 0x8d9   : > { %s1634_s17 = scalar_lea.hbm %s1959_s26, 128  ;;  %s1638_s21 = scalar_lea.hbm %s2010_s8, 256 }
 0x8da   : > { %p1635_p4 = scmp.ne.s32.totalorder %s1959_s26, %s1634_s17  ;;  %p1639_p9 = scmp.lt.u32.totalorder %s1959_s26, %s2010_s8 }
 0x8db   : > { %p1640_p10 = scmp.lt.u32.totalorder %s1638_s21, %s1634_s17  ;;  %p1642_p12 = scmp.lt.u32.totalorder %s1634_s17, %s1959_s26 }
 0x8dc   : > { %p1636_p7 = pnand %p1635_p4, %p1771_p5 }
 0x8dd   : > { %p1641_p11 = por %p1640_p10, %p1639_p9 }
 0x8de   : > { %p1637_p8 = pneg %p1636_p7 }
 0x8df   : > { %p1643_p13 = por %p1642_p12, %p1641_p11 }
 0x8e1   : > { %p1644_p0 = pnand %p1643_p13, %p1637_p8 }
 0x8e3   : > { %1647 = shalt.err (!%p1644_p0)
}
 0x8e4   : > { %1568 = dma.vmem_to_hbm [thread:$0]  (%p1771_p5), %s1961_s23, 128, %s1959_s26, %s1269_s10  }
 0x8e5 PF: > { %p1574_p1 = scmp.ge.s32.totalorder %s1682_s30, 2  ;;  %s1294_s25 = sand.u32 1, %s1670_s27  }
 0x8e6   : > { %s1295_s12 = scalar_lea.sflag [#allocation3], %s1294_s25 }
 0x8e7   : > { %p1571_p2 = pnand %p1574_p1, %p1775_p6 }
 0x8e9   : > { %1665 = dma.done.wait (!%p1571_p2), %s1295_s12, 128  }
 0x8ea   : > { %1667 = vsyncadd (!%p1571_p2), %s1295_s12, 4294967168  ;;  %p18_p3 = scmp.ge.s32.totalorder %s1758_s11, 4   ;;  %s2013_s27 = smov %s1674_s28 }
 0x8eb   : > { %s2014_s28 = smov %s1678_s29  ;;  %s2015_s29 = smov %s1769_s14 }
 0x8ec   : > { %s2016_s30 = smov %s1758_s11  ;;  %20 = sbr.rel (!%p18_p3) target bundleno = 3 (0x3), region = 91 }
 0x8f3   :  { %1300 = vsyncpa [#allocation3], 1 }
 0x8f4   :  { %1302 = vsyncpa [#allocation3 + $0x1], 1 }

</bundles_post_ra>
